<compile_context>
chip_gen: v7x
topology: tpu7x:2x2x1
jax: 0.10.0
libtpu: 0.0.40
codegen_flags: <defaults>
</compile_context>

<pallas_src>
import functools

import jax
import jax.numpy as jnp
from jax import lax
from jax.experimental import pallas as pl
from jax.experimental.pallas import tpu as pltpu

_LANE = 128


def _mish(x):
    # mish(x) = x * tanh(softplus(x)) = x * (1 - 2 / ((1 + e^x)^2 + 1))
    # Single exp + approx EUP reciprocal; clamp the exp argument so e^x stays
    # finite (for x > ~20 the factor is 1.0 in f32 anyway).
    e = jnp.exp(jnp.minimum(x, 20.0))
    d = (1.0 + e) * (1.0 + e) + 1.0
    return x * (1.0 - 2.0 * pl.reciprocal(d, approx=True))


def _softmax_lastdim(e):
    # Exact normalization: this runs on a tiny (Co, Co) tile, so an exact
    # divide is essentially free and attention rows sum to 1 exactly.
    m = jnp.max(e, axis=-1, keepdims=True)
    p = jnp.exp(e - m)
    return p / jnp.sum(p, axis=-1, keepdims=True)


def _self_attn_kernel(w_ref, beta_ref, x_ref, y_ref, ox_ref, oy_ref,
                      qx_ref, ky_ref, *, n_per_batch):
    # x_ref / y_ref : (Ci, bt*Np) lane-dense input slabs for `bt` batches
    # ox_ref/oy_ref : (Co, bt*Np) lane-dense output slabs
    # qx_ref/ky_ref : (Co, bt*Np) VMEM scratch (conv+Mish activations)
    npb = n_per_batch
    bt = x_ref.shape[1] // npb

    W = w_ref[...]                       # (Co, Ci), resident across the grid
    beta = beta_ref[0]                   # scalar read from SMEM

    # 1x1 conv (no bias) + Mish for the whole batch block: one wide MXU
    # matmul per input instead of bt tiny per-batch matmuls.
    qx_ref[...] = _mish(jnp.dot(W, x_ref[...],
                                preferred_element_type=jnp.float32))
    ky_ref[...] = _mish(jnp.dot(W, y_ref[...],
                                preferred_element_type=jnp.float32))

    def body(i, carry):
        col = pl.multiple_of(i * npb, _LANE)
        qx = qx_ref[:, pl.ds(col, npb)]                  # (Co, Np)
        ky = ky_ref[:, pl.ds(col, npb)]                  # (Co, Np)

        # energy = Qx @ Ky^T via an "NT" contraction of the last dims
        # (no (N, Co) transpose / temp).
        e_xy = lax.dot_general(qx, ky, (((1,), (1,)), ((), ())),
                               preferred_element_type=jnp.float32)  # (Co, Co)

        # A_xy = softmax(E); A_yx = softmax(E^T).  E^T is one tiny (Co, Co)
        # XLU transpose -- the XLU is idle here and this replaces a second
        # full-N MXU contraction.  beta is folded into the small attention
        # matrices before the value matmul.
        a_xy = _softmax_lastdim(e_xy) * beta
        a_yx = _softmax_lastdim(jnp.transpose(e_xy)) * beta

        out_x = jnp.dot(a_xy, qx, preferred_element_type=jnp.float32) + qx
        out_y = jnp.dot(a_yx, ky, preferred_element_type=jnp.float32) + ky

        # Wide, 128-lane-aligned unmasked stores into the lane-dense slabs.
        ox_ref[:, pl.ds(col, npb)] = out_x.astype(ox_ref.dtype)
        oy_ref[:, pl.ds(col, npb)] = out_y.astype(oy_ref.dtype)
        return carry

    # Rolled loop with a capped unroll: full unroll at large bt would inflate
    # vreg live ranges (64 vregs) and spill.
    lax.fori_loop(0, bt, body, 0, unroll=min(bt, 4))


def _choose_batch_block(batch, ci, n_pad):
    # Aim for ~512 KiB input slabs per grid step (DMA / per-step-overhead
    # amortization) ...
    bytes_per_batch = ci * n_pad * 4
    bt_bytes = max(1, (512 * 1024) // bytes_per_batch)
    # ... but keep >= ~8 grid steps so both v7x TensorCores reach pipeline
    # steady state.  At small batch the steady-state goal wins (there is
    # little data to amortize anyway).
    bt_steps = max(1, batch // 8)
    return int(max(1, min(batch, 64, bt_bytes, bt_steps)))


def _pick_vmem_limit(need_bytes):
    # Only raise the scoped-VMEM limit above the 32 MiB default when the
    # blocks actually need it, and never request all of physical VMEM
    # (v7x has only 64 MiB per TensorCore).
    default_scoped = 32 * 1024 * 1024
    want = need_bytes + need_bytes // 4
    if want <= default_scoped:
        return None
    try:
        phys = pltpu.get_tpu_info().vmem_capacity_bytes
    except Exception:
        phys = 64 * 1024 * 1024  # conservative (v7x per-TC) fallback
    return int(min(want, phys * 3 // 4))


@functools.partial(jax.jit, static_argnames=("batch_block",))
def self_attention_fc(x, y, w, beta, *, batch_block=None):
    """x, y: (B, Ci, N) f32; w: (Co, Ci) f32 (Conv1d k=1 weight); beta scalar."""
    B, Ci, N = x.shape
    Co = w.shape[0]

    n_pad = pl.cdiv(N, _LANE) * _LANE
    bt = batch_block if batch_block is not None else _choose_batch_block(B, Ci, n_pad)
    b_pad = pl.cdiv(B, bt) * bt
    block_cols = bt * n_pad

    # Zero padding is exact for this op: padded columns/batches produce
    # mish(0) = 0 activations, contribute 0 to the energy contraction and
    # yield 0 output columns, which we slice away below.
    def to_lane_dense(a):
        a = jnp.pad(a, ((0, b_pad - B), (0, 0), (0, n_pad - N)))
        return jnp.transpose(a, (1, 0, 2)).reshape(Ci, b_pad * n_pad)

    xf = to_lane_dense(x)
    yf = to_lane_dense(y)
    beta_arr = jnp.asarray(beta, jnp.float32).reshape(1)

    # Per-step VMEM residency: double-buffered x/y inputs and two outputs,
    # plus the two scratch activation slabs and the (tiny) weight.
    need = 4 * block_cols * (2 * 2 * Ci + 2 * 2 * Co + 2 * Co) + 4 * Co * Ci * 2
    vmem_limit = _pick_vmem_limit(need)

    kernel = functools.partial(_self_attn_kernel, n_per_batch=n_pad)

    out_shape = (
        jax.ShapeDtypeStruct((Co, b_pad * n_pad), jnp.float32),
        jax.ShapeDtypeStruct((Co, b_pad * n_pad), jnp.float32),
    )

    grid_spec = pltpu.PrefetchScalarGridSpec(
        num_scalar_prefetch=0,
        grid=(b_pad // bt,),
        in_specs=[
            pl.BlockSpec((Co, Ci), lambda b: (0, 0)),                 # conv weight
            pl.BlockSpec(memory_space=pltpu.MemorySpace.SMEM),        # beta scalar
            pl.BlockSpec((Ci, block_cols), lambda b: (0, b)),         # x slab
            pl.BlockSpec((Ci, block_cols), lambda b: (0, b)),         # y slab
        ],
        out_specs=[
            pl.BlockSpec((Co, block_cols), lambda b: (0, b)),
            pl.BlockSpec((Co, block_cols), lambda b: (0, b)),
        ],
        scratch_shapes=[
            pltpu.VMEM((Co, block_cols), jnp.float32),                # Qx
            pltpu.VMEM((Co, block_cols), jnp.float32),                # Ky
        ],
    )

    ox, oy = pl.pallas_call(
        kernel,
        out_shape=out_shape,
        grid_spec=grid_spec,
        compiler_params=pltpu.CompilerParams(
            dimension_semantics=("parallel",),        # batch axis -> both TCs
            vmem_limit_bytes=vmem_limit,              # None -> compiler default
        ),
    )(w, beta_arr, xf, yf)

    def from_lane_dense(o):
        o = o.reshape(Co, b_pad, n_pad)
        return jnp.transpose(o, (1, 0, 2))[:B, :, :N]

    return from_lane_dense(ox), from_lane_dense(oy)


def _reference(x, y, w, beta):
    # Pure-JAX reference (mirrors the PyTorch forward exactly).
    def mish(v):
        return v * jnp.tanh(jax.nn.softplus(v))

    qx = mish(jnp.einsum("oc,bcn->bon", w, x))
    ky = mish(jnp.einsum("oc,bcn->bon", w, y))
    energy = jnp.einsum("bon,bpn->bop", qx, ky)
    a_xy = jax.nn.softmax(energy, axis=-1)
    a_yx = jax.nn.softmax(jnp.swapaxes(energy, 1, 2), axis=-1)
    out_x = beta * jnp.einsum("bop,bpn->bon", a_xy, qx) + qx
    out_y = beta * jnp.einsum("bop,bpn->bon", a_yx, ky) + ky
    return out_x, out_y


if __name__ == "__main__":
    # Small shapes; N deliberately not a lane multiple to exercise the
    # padding path, B chosen so the auto batch_block gives several grid steps.
    B, in_dim, out_dim, N = 16, 8, 16, 96

    key = jax.random.PRNGKey(0)
    kx, ky_, kw = jax.random.split(key, 3)
    x = jax.random.normal(kx, (B, in_dim, N), dtype=jnp.float32)
    y = jax.random.normal(ky_, (B, in_dim, N), dtype=jnp.float32)
    # Conv1d(kernel_size=1, bias=False) weight is (out_dim, in_dim, 1) -> squeezed.
    w = jax.random.normal(kw, (out_dim, in_dim), dtype=jnp.float32) * 0.1
    # NOTE: PyTorch inits beta to 0; use 0.5 so the attention path contributes.
    beta = jnp.float32(0.5)

    out_x, out_y = self_attention_fc(x, y, w, beta)
    jax.block_until_ready((out_x, out_y))

    ref_x, ref_y = _reference(x, y, w, beta)
    # Tolerance covers the EUP approximate reciprocal inside the fused Mish
    # and the default TPU matmul precision.
    assert jnp.allclose(out_x, ref_x, atol=1e-2, rtol=1e-2)
    assert jnp.allclose(out_y, ref_y, atol=1e-2, rtol=1e-2)

    print("KERNEL_OK")
</pallas_src>

<mosaic_0001>
module attributes {stable_mosaic.version = 11 : i64} {
  func.func @_self_attn_kernel(%arg0: i32, %arg1: memref<16x8xf32, #tpu.memory_space<vmem>>, %arg2: memref<1xf32, #tpu.memory_space<smem>>, %arg3: memref<8x256xf32, #tpu.memory_space<vmem>>, %arg4: memref<8x256xf32, #tpu.memory_space<vmem>>, %arg5: memref<16x256xf32, #tpu.memory_space<vmem>>, %arg6: memref<16x256xf32, #tpu.memory_space<vmem>>, %arg7: memref<16x256xf32, #tpu.memory_space<vmem>>, %arg8: memref<16x256xf32, #tpu.memory_space<vmem>>) attributes {dimension_semantics = [#tpu.dimension_semantics<parallel>], iteration_bounds = array<i64: 8>, scalar_prefetch = 0 : i64, scratch_operands = 2 : i64, tpu.core_type = #tpu.core_type<tc>, window_params = [{pipeline_mode = #tpu.pipeline_mode<synchronous>, transform_indices = @transform_0, window_bounds = array<i64: 16, 8>}, {transform_indices = @transform_1, window_bounds = array<i64: 1>}, {transform_indices = @transform_2, window_bounds = array<i64: 8, 256>}, {transform_indices = @transform_3, window_bounds = array<i64: 8, 256>}, {transform_indices = @transform_4, window_bounds = array<i64: 16, 256>}, {transform_indices = @transform_5, window_bounds = array<i64: 16, 256>}]} {
    %c0 = arith.constant 0 : index
    %c0_0 = arith.constant 0 : index
    %0 = vector.load %arg1[%c0, %c0_0] : memref<16x8xf32, #tpu.memory_space<vmem>>, vector<16x8xf32>
    %c0_1 = arith.constant 0 : index
    %1 = memref.load %arg2[%c0_1] : memref<1xf32, #tpu.memory_space<smem>>
    %c0_2 = arith.constant 0 : index
    %c0_3 = arith.constant 0 : index
    %2 = vector.load %arg3[%c0_2, %c0_3] : memref<8x256xf32, #tpu.memory_space<vmem>>, vector<8x256xf32>
    %cst = arith.constant dense<0.000000e+00> : vector<16x256xf32>
    %3 = tpu.matmul %0, %2, %cst {dimension_numbers = #tpu.dot_dimension_numbers<[1], [0], [0], [1], [0, 0, 1, 1], [], []>} : vector<16x8xf32>, vector<8x256xf32>, vector<16x256xf32> -> vector<16x256xf32>
    %cst_4 = arith.constant 2.000000e+01 : f32
    %4 = vector.broadcast %cst_4 : f32 to vector<16x256xf32>
    %5 = arith.minimumf %3, %4 : vector<16x256xf32>
    %6 = math.exp %5 : vector<16x256xf32>
    %cst_5 = arith.constant 1.000000e+00 : f32
    %7 = vector.broadcast %cst_5 : f32 to vector<16x256xf32>
    %8 = arith.addf %7, %6 : vector<16x256xf32>
    %cst_6 = arith.constant 1.000000e+00 : f32
    %9 = vector.broadcast %cst_6 : f32 to vector<16x256xf32>
    %10 = arith.addf %9, %6 : vector<16x256xf32>
    %11 = arith.mulf %8, %10 : vector<16x256xf32>
    %cst_7 = arith.constant 1.000000e+00 : f32
    %12 = vector.broadcast %cst_7 : f32 to vector<16x256xf32>
    %13 = arith.addf %11, %12 : vector<16x256xf32>
    %14 = tpu.reciprocal %13 {approx = true} : vector<16x256xf32> -> vector<16x256xf32>
    %cst_8 = arith.constant 2.000000e+00 : f32
    %15 = vector.broadcast %cst_8 : f32 to vector<16x256xf32>
    %16 = arith.mulf %15, %14 : vector<16x256xf32>
    %cst_9 = arith.constant 1.000000e+00 : f32
    %17 = vector.broadcast %cst_9 : f32 to vector<16x256xf32>
    %18 = arith.subf %17, %16 : vector<16x256xf32>
    %19 = arith.mulf %3, %18 : vector<16x256xf32>
    %c0_10 = arith.constant 0 : index
    %c0_11 = arith.constant 0 : index
    %20 = vector.load %arg7[%c0_10, %c0_11] : memref<16x256xf32, #tpu.memory_space<vmem>>, vector<16x256xf32>
    tpu.vector_store %arg7[%c0_10, %c0_11], %19 {strides = array<i32>} : memref<16x256xf32, #tpu.memory_space<vmem>>, vector<16x256xf32>,
    %c0_12 = arith.constant 0 : index
    %c0_13 = arith.constant 0 : index
    %21 = vector.load %arg4[%c0_12, %c0_13] : memref<8x256xf32, #tpu.memory_space<vmem>>, vector<8x256xf32>
    %cst_14 = arith.constant dense<0.000000e+00> : vector<16x256xf32>
    %22 = tpu.matmul %0, %21, %cst_14 {dimension_numbers = #tpu.dot_dimension_numbers<[1], [0], [0], [1], [0, 0, 1, 1], [], []>} : vector<16x8xf32>, vector<8x256xf32>, vector<16x256xf32> -> vector<16x256xf32>
    %cst_15 = arith.constant 2.000000e+01 : f32
    %23 = vector.broadcast %cst_15 : f32 to vector<16x256xf32>
    %24 = arith.minimumf %22, %23 : vector<16x256xf32>
    %25 = math.exp %24 : vector<16x256xf32>
    %cst_16 = arith.constant 1.000000e+00 : f32
    %26 = vector.broadcast %cst_16 : f32 to vector<16x256xf32>
    %27 = arith.addf %26, %25 : vector<16x256xf32>
    %cst_17 = arith.constant 1.000000e+00 : f32
    %28 = vector.broadcast %cst_17 : f32 to vector<16x256xf32>
    %29 = arith.addf %28, %25 : vector<16x256xf32>
    %30 = arith.mulf %27, %29 : vector<16x256xf32>
    %cst_18 = arith.constant 1.000000e+00 : f32
    %31 = vector.broadcast %cst_18 : f32 to vector<16x256xf32>
    %32 = arith.addf %30, %31 : vector<16x256xf32>
    %33 = tpu.reciprocal %32 {approx = true} : vector<16x256xf32> -> vector<16x256xf32>
    %cst_19 = arith.constant 2.000000e+00 : f32
    %34 = vector.broadcast %cst_19 : f32 to vector<16x256xf32>
    %35 = arith.mulf %34, %33 : vector<16x256xf32>
    %cst_20 = arith.constant 1.000000e+00 : f32
    %36 = vector.broadcast %cst_20 : f32 to vector<16x256xf32>
    %37 = arith.subf %36, %35 : vector<16x256xf32>
    %38 = arith.mulf %22, %37 : vector<16x256xf32>
    %c0_21 = arith.constant 0 : index
    %c0_22 = arith.constant 0 : index
    %39 = vector.load %arg8[%c0_21, %c0_22] : memref<16x256xf32, #tpu.memory_space<vmem>>, vector<16x256xf32>
    tpu.vector_store %arg8[%c0_21, %c0_22], %38 {strides = array<i32>} : memref<16x256xf32, #tpu.memory_space<vmem>>, vector<16x256xf32>,
    %c0_i32 = arith.constant 0 : i32
    %c128_i32 = arith.constant 128 : i32
    %40 = arith.muli %c0_i32, %c128_i32 : i32
    %41 = tpu.assume_multiple %40, 128 : i32
    %c0_23 = arith.constant 0 : index
    %42 = arith.index_cast %41 : i32 to index
    %43 = vector.load %arg7[%c0_23, %42] : memref<16x256xf32, #tpu.memory_space<vmem>>, vector<16x128xf32>
    %c0_24 = arith.constant 0 : index
    %44 = arith.index_cast %41 : i32 to index
    %45 = vector.load %arg8[%c0_24, %44] : memref<16x256xf32, #tpu.memory_space<vmem>>, vector<16x128xf32>
    %cst_25 = arith.constant dense<0.000000e+00> : vector<16x16xf32>
    %46 = tpu.matmul %43, %45, %cst_25 {dimension_numbers = #tpu.dot_dimension_numbers<[1], [1], [0], [0], [0, 0, 1, 0], [], []>} : vector<16x128xf32>, vector<16x128xf32>, vector<16x16xf32> -> vector<16x16xf32>
    %cst_26 = arith.constant dense<0xFF800000> : vector<16xf32>
    %47 = vector.multi_reduction <maximumf>, %46, %cst_26 [1] : vector<16x16xf32> to vector<16xf32>
    %48 = vector.shape_cast %47 : vector<16xf32> to vector<16x1xf32>
    %49 = vector.broadcast %48 : vector<16x1xf32> to vector<16x16xf32>
    %50 = arith.subf %46, %49 : vector<16x16xf32>
    %51 = math.exp %50 : vector<16x16xf32>
    %cst_27 = arith.constant dense<0.000000e+00> : vector<16xf32>
    %52 = vector.multi_reduction <add>, %51, %cst_27 [1] : vector<16x16xf32> to vector<16xf32>
    %53 = vector.shape_cast %52 : vector<16xf32> to vector<16x1xf32>
    %54 = vector.broadcast %53 : vector<16x1xf32> to vector<16x16xf32>
    %55 = arith.divf %51, %54 : vector<16x16xf32>
    %56 = vector.broadcast %1 : f32 to vector<16x16xf32>
    %57 = arith.mulf %55, %56 : vector<16x16xf32>
    %58 = tpu.transpose %46, [1, 0] : vector<16x16xf32> -> vector<16x16xf32>
    %cst_28 = arith.constant dense<0xFF800000> : vector<16xf32>
    %59 = vector.multi_reduction <maximumf>, %58, %cst_28 [1] : vector<16x16xf32> to vector<16xf32>
    %60 = vector.shape_cast %59 : vector<16xf32> to vector<16x1xf32>
    %61 = vector.broadcast %60 : vector<16x1xf32> to vector<16x16xf32>
    %62 = arith.subf %58, %61 : vector<16x16xf32>
    %63 = math.exp %62 : vector<16x16xf32>
    %cst_29 = arith.constant dense<0.000000e+00> : vector<16xf32>
    %64 = vector.multi_reduction <add>, %63, %cst_29 [1] : vector<16x16xf32> to vector<16xf32>
    %65 = vector.shape_cast %64 : vector<16xf32> to vector<16x1xf32>
    %66 = vector.broadcast %65 : vector<16x1xf32> to vector<16x16xf32>
    %67 = arith.divf %63, %66 : vector<16x16xf32>
    %68 = vector.broadcast %1 : f32 to vector<16x16xf32>
    %69 = arith.mulf %67, %68 : vector<16x16xf32>
    %cst_30 = arith.constant dense<0.000000e+00> : vector<16x128xf32>
    %70 = tpu.matmul %57, %43, %cst_30 {dimension_numbers = #tpu.dot_dimension_numbers<[1], [0], [0], [1], [0, 0, 1, 1], [], []>} : vector<16x16xf32>, vector<16x128xf32>, vector<16x128xf32> -> vector<16x128xf32>
    %71 = arith.addf %70, %43 : vector<16x128xf32>
    %cst_31 = arith.constant dense<0.000000e+00> : vector<16x128xf32>
    %72 = tpu.matmul %69, %45, %cst_31 {dimension_numbers = #tpu.dot_dimension_numbers<[1], [0], [0], [1], [0, 0, 1, 1], [], []>} : vector<16x16xf32>, vector<16x128xf32>, vector<16x128xf32> -> vector<16x128xf32>
    %73 = arith.addf %72, %45 : vector<16x128xf32>
    %c0_32 = arith.constant 0 : index
    %74 = arith.index_cast %41 : i32 to index
    %75 = vector.load %arg5[%c0_32, %74] : memref<16x256xf32, #tpu.memory_space<vmem>>, vector<16x128xf32>
    tpu.vector_store %arg5[%c0_32, %74], %71 {strides = array<i32>} : memref<16x256xf32, #tpu.memory_space<vmem>>, vector<16x128xf32>,
    %c0_33 = arith.constant 0 : index
    %76 = arith.index_cast %41 : i32 to index
    %77 = vector.load %arg6[%c0_33, %76] : memref<16x256xf32, #tpu.memory_space<vmem>>, vector<16x128xf32>
    tpu.vector_store %arg6[%c0_33, %76], %73 {strides = array<i32>} : memref<16x256xf32, #tpu.memory_space<vmem>>, vector<16x128xf32>,
    %c1_i32 = arith.constant 1 : i32
    %c128_i32_34 = arith.constant 128 : i32
    %78 = arith.muli %c1_i32, %c128_i32_34 : i32
    %79 = tpu.assume_multiple %78, 128 : i32
    %c0_35 = arith.constant 0 : index
    %80 = arith.index_cast %79 : i32 to index
    %81 = vector.load %arg7[%c0_35, %80] : memref<16x256xf32, #tpu.memory_space<vmem>>, vector<16x128xf32>
    %c0_36 = arith.constant 0 : index
    %82 = arith.index_cast %79 : i32 to index
    %83 = vector.load %arg8[%c0_36, %82] : memref<16x256xf32, #tpu.memory_space<vmem>>, vector<16x128xf32>
    %cst_37 = arith.constant dense<0.000000e+00> : vector<16x16xf32>
    %84 = tpu.matmul %81, %83, %cst_37 {dimension_numbers = #tpu.dot_dimension_numbers<[1], [1], [0], [0], [0, 0, 1, 0], [], []>} : vector<16x128xf32>, vector<16x128xf32>, vector<16x16xf32> -> vector<16x16xf32>
    %cst_38 = arith.constant dense<0xFF800000> : vector<16xf32>
    %85 = vector.multi_reduction <maximumf>, %84, %cst_38 [1] : vector<16x16xf32> to vector<16xf32>
    %86 = vector.shape_cast %85 : vector<16xf32> to vector<16x1xf32>
    %87 = vector.broadcast %86 : vector<16x1xf32> to vector<16x16xf32>
    %88 = arith.subf %84, %87 : vector<16x16xf32>
    %89 = math.exp %88 : vector<16x16xf32>
    %cst_39 = arith.constant dense<0.000000e+00> : vector<16xf32>
    %90 = vector.multi_reduction <add>, %89, %cst_39 [1] : vector<16x16xf32> to vector<16xf32>
    %91 = vector.shape_cast %90 : vector<16xf32> to vector<16x1xf32>
    %92 = vector.broadcast %91 : vector<16x1xf32> to vector<16x16xf32>
    %93 = arith.divf %89, %92 : vector<16x16xf32>
    %94 = vector.broadcast %1 : f32 to vector<16x16xf32>
    %95 = arith.mulf %93, %94 : vector<16x16xf32>
    %96 = tpu.transpose %84, [1, 0] : vector<16x16xf32> -> vector<16x16xf32>
    %cst_40 = arith.constant dense<0xFF800000> : vector<16xf32>
    %97 = vector.multi_reduction <maximumf>, %96, %cst_40 [1] : vector<16x16xf32> to vector<16xf32>
    %98 = vector.shape_cast %97 : vector<16xf32> to vector<16x1xf32>
    %99 = vector.broadcast %98 : vector<16x1xf32> to vector<16x16xf32>
    %100 = arith.subf %96, %99 : vector<16x16xf32>
    %101 = math.exp %100 : vector<16x16xf32>
    %cst_41 = arith.constant dense<0.000000e+00> : vector<16xf32>
    %102 = vector.multi_reduction <add>, %101, %cst_41 [1] : vector<16x16xf32> to vector<16xf32>
    %103 = vector.shape_cast %102 : vector<16xf32> to vector<16x1xf32>
    %104 = vector.broadcast %103 : vector<16x1xf32> to vector<16x16xf32>
    %105 = arith.divf %101, %104 : vector<16x16xf32>
    %106 = vector.broadcast %1 : f32 to vector<16x16xf32>
    %107 = arith.mulf %105, %106 : vector<16x16xf32>
    %cst_42 = arith.constant dense<0.000000e+00> : vector<16x128xf32>
    %108 = tpu.matmul %95, %81, %cst_42 {dimension_numbers = #tpu.dot_dimension_numbers<[1], [0], [0], [1], [0, 0, 1, 1], [], []>} : vector<16x16xf32>, vector<16x128xf32>, vector<16x128xf32> -> vector<16x128xf32>
    %109 = arith.addf %108, %81 : vector<16x128xf32>
    %cst_43 = arith.constant dense<0.000000e+00> : vector<16x128xf32>
    %110 = tpu.matmul %107, %83, %cst_43 {dimension_numbers = #tpu.dot_dimension_numbers<[1], [0], [0], [1], [0, 0, 1, 1], [], []>} : vector<16x16xf32>, vector<16x128xf32>, vector<16x128xf32> -> vector<16x128xf32>
    %111 = arith.addf %110, %83 : vector<16x128xf32>
    %c0_44 = arith.constant 0 : index
    %112 = arith.index_cast %79 : i32 to index
    %113 = vector.load %arg5[%c0_44, %112] : memref<16x256xf32, #tpu.memory_space<vmem>>, vector<16x128xf32>
    tpu.vector_store %arg5[%c0_44, %112], %109 {strides = array<i32>} : memref<16x256xf32, #tpu.memory_space<vmem>>, vector<16x128xf32>,
    %c0_45 = arith.constant 0 : index
    %114 = arith.index_cast %79 : i32 to index
    %115 = vector.load %arg6[%c0_45, %114] : memref<16x256xf32, #tpu.memory_space<vmem>>, vector<16x128xf32>
    tpu.vector_store %arg6[%c0_45, %114], %111 {strides = array<i32>} : memref<16x256xf32, #tpu.memory_space<vmem>>, vector<16x128xf32>,
    %c2_i32 = arith.constant 2 : i32
    return
  }
  func.func @transform_0(%arg0: i32) -> (i32, i32) {
    %c0_i32 = arith.constant 0 : i32
    %c0_i32_0 = arith.constant 0 : i32
    %c0_i32_1 = arith.constant 0 : i32
    return %c0_i32, %c0_i32_0 : i32, i32
  }
  func.func @transform_1(%arg0: i32) -> i32 {
    %c0_i32 = arith.constant 0 : i32
    %c0_i32_0 = arith.constant 0 : i32
    return %c0_i32 : i32
  }
  func.func @transform_2(%arg0: i32) -> (i32, i32) {
    %c0_i32 = arith.constant 0 : i32
    %c0_i32_0 = arith.constant 0 : i32
    return %c0_i32, %arg0 : i32, i32
  }
  func.func @transform_3(%arg0: i32) -> (i32, i32) {
    %c0_i32 = arith.constant 0 : i32
    %c0_i32_0 = arith.constant 0 : i32
    return %c0_i32, %arg0 : i32, i32
  }
  func.func @transform_4(%arg0: i32) -> (i32, i32) {
    %c0_i32 = arith.constant 0 : i32
    %c0_i32_0 = arith.constant 0 : i32
    return %c0_i32, %arg0 : i32, i32
  }
  func.func @transform_5(%arg0: i32) -> (i32, i32) {
    %c0_i32 = arith.constant 0 : i32
    %c0_i32_0 = arith.constant 0 : i32
    return %c0_i32, %arg0 : i32, i32
  }
}

</mosaic_0001>

<bundles_post_ra>
// kernel: self_attention_fc.1
= control target key start
LH: loop header
LB: loop body
LE: loop exit
PB: predicated region body
PF: predicated region fallthrough
CT: control target
= control target key end

     0   :  { %s1796_s0 = inlined_call_operand.vmem [shape: f32[16,8], index: 0, kind: input, shape index: {}]   ;;  %s1797_s1 = inlined_call_operand.<no memory space> [shape: f32[1], index: 1, kind: input, shape index: {}]   ;;  %s1798_s2 = inlined_call_operand.vmem [shape: f32[8,2048], index: 2, kind: input, shape index: {}]   ;;  %s1799_s3 = inlined_call_operand.vmem [shape: f32[8,2048], index: 3, kind: input, shape index: {}]   ;;  %s1800_s4 = inlined_call_operand.vmem [shape: f32[16,2048], index: 4, kind: output, shape index: {0}]   ;;  %s1801_s5 = inlined_call_operand.vmem [shape: f32[16,2048], index: 5, kind: output, shape index: {1}]  }
   0x1   :  { %11 = sst [smem:[#allocation4]] %s1797_s1 }
   0x2   :  { %s1595_s20 = smov 0   ;;  %s1597_s21 = smov 0  }
   0x3   :  { %s1599_s22 = smov 0  }
   0x4 LB: > { %s1608_s1 = sadd.s32 4294967295, %s1559_s22   ;;  %s1610_s23 = sadd.s32 1, %s1559_s22   ;;  %s1559_s22 = sphi %s1599_s22, %s1805_s22   ;;  %s1555_s21 = sphi %s1597_s21, %s1804_s21   ;;  %s1551_s20 = sphi %s1595_s20, %s1803_s20  }
   0x5   : > { %s115_s24 = ssub.s32 %s1559_s22, %s1610_s23  ;;  %s118_s25 = sadd.s32 1, %s1555_s21 }
   0x6   : > { %p116_p0 = scmp.eq.s32.totalorder %s115_s24, 0  ;;  %p128_p1 = scmp.ne.s32.totalorder %s1555_s21, %s1551_s20 }
   0x7   : > { %p129_p2 = scmp.eq.s32.totalorder %s1608_s1, 7  ;;  %p1325_p3 = scmp.ge.s32.totalorder %s1559_s22, 1 }
   0x8   : > { %s1618_s26 = scalar_select %p116_p0, %s1555_s21, %s118_s25  }
   0x9   : > { %p1620_p4 = por %p129_p2, %p128_p1  ;;  %p203_p5 = scmp.lt.s32.totalorder %s1559_s22, 9 }
   0xb   : > { %p204_p6 = pnand %p1325_p3, %p203_p5 }
   0xc   : > { %s1328_s28 = sshll.u32 (!%p204_p6), %s1608_s1, 1  ;;  %v1561_v0 = vmov (!%p204_p6), 0.0   ;;  %v253_v1 = vld [vmem:[%s1796_s0] sm:$0xff] (!%p204_p6)  ;;  %vm258_vm0 = vcmask (!%p204_p6), 64512   ;;  %v254_v6 = vld [vmem:[%s1796_s0 + $0x8] sm:$0xff] (!%p204_p6)  ;;  %vm588_vm1 = vcmask (!%p204_p6), 130048  }
   0xd   : > { %207 = sbr.rel (%p204_p6) target bundleno = 1769 (0x6e9), region = 36  ;;  %p240_p7 = scmp.lt.s32.totalorder (!%p204_p6), %s1328_s28, 15  ;;  %329 = vmatprep.mubr.f32.mxu0 (!%p204_p6), %v1561_v0  ;;  %452 = vmatprep.mubr.f32.mxu1 (!%p204_p6), %v1561_v0 }
   0xe   : > { %s255_s15 = sld [smem:[#allocation4]] (!%p204_p6)  ;;  %s230_s16 = sand.u32 (!%p204_p6), 1, %s1551_s20  }
   0xf   : > { %s1717_s17 = sshll.u32 (!%p204_p6), %s230_s16, 5 }
  0x10   : > { %s1722_s18 = scalar_lea.vmem (!%p204_p6), [#allocation5], %s1717_s17  ;;  %s1754_s19 = scalar_lea.vmem (!%p204_p6), [#allocation6], %s1717_s17 }
  0x14   : > { %s1807_s28 = smov (!%p240_p7, %s1328_s28), 15  ;;  %s1356_s20 = sshll.u32 (%p1620_p4), %s1608_s1, 4 }
  0x15   : > { %s1329_s29 = sshll.u32 %s1807_s28, 3  ;;  %s1178_s25 = scalar_lea.vmem (%p1620_p4), %s1800_s4, %s1356_s20 }
  0x16   : > { %s243_s7 = scalar_lea.vmem %s1798_s2, %s1329_s29  ;;  %s249_s10 = scalar_lea.vmem %s1799_s3, %s1329_s29 }
  0x17   : > { %v257_v2 = vld [vmem:[%s243_s7 + $0x8] sm:$0xff]  ;;  %v256_v4 = vld [vmem:[%s243_s7] sm:$0xff] }
  0x18   : > { %v387_v3 = vld [vmem:[%s249_s10 + $0x8] sm:$0xff]  ;;  %265 = vmatprep.subr.mxu0 %v257_v2  ;;  %v386_v5 = vld [vmem:[%s249_s10] sm:$0xff] }
  0x19   : > { %388 = vmatprep.subr.mxu1 %v387_v3  ;;  %266 = vmatpush1.msra.mxu0 %v256_v4 }
  0x1a   : > { %389 = vmatpush1.msra.mxu1 %v386_v5  ;;  %1332 = vmatmul.mubr.msk.f32.vlgmr.msra.gmra.mrb[0].mxu0 %vm258_vm0, %v253_v1 }
  0x1b   : > { %1334 = vmatmul.mubr.msk.f32.vlgmr.msra.gmra.mrb[0].mxu1 %vm258_vm0, %v253_v1  ;;  %335 = vmatprep.mubr.f32.mxu0 %v1561_v0 }
  0x1c   : > { %458 = vmatprep.mubr.f32.mxu1 %v1561_v0 }
  0x1e   : > { %1333 = vmatmul.mubr.msk.f32.gmra.mrb[2].mxu0 %vm258_vm0, %v254_v6 }
  0x1f   : > { %1335 = vmatmul.mubr.msk.f32.gmra.mrb[2].mxu1 %vm258_vm0, %v254_v6 }
  0xed   : > { %v1637_v7 = vpop.f32.mrb[0].mxu0 }
  0xee   : > { %v1639_v8 = vpop.f32.mrb[0].mxu1  ;;  %v342_v9 = vmin.f32 %v1637_v7, 20.0  ;;  %v1643_v11 = vpop.f32.mrb[1].mxu0 }
  0xef   : > { %v465_v10 = vmin.f32 %v1639_v8, 20.0  ;;  %v1645_v12 = vpop.f32.mrb[1].mxu1  ;;  %v343_v13 = vmin.f32 %v1643_v11, 20.0 }
  0xf0   : > { %v466_v14 = vmin.f32 %v1645_v12, 20.0  ;;  %v346_v15 = vmul.f32 1.442695, %v342_v9 }
  0xf1   : > { %v469_v16 = vmul.f32 1.442695, %v465_v10  ;;  %v348_v17 = vmul.f32 1.442695, %v343_v13  ;;  %v1649_v19 = vpop.f32.mrb[2].mxu0 }
  0xf2   : > { %v471_v18 = vmul.f32 1.442695, %v466_v14  ;;  %v1651_v20 = vpop.f32.mrb[2].mxu1  ;;  %1473 = vpow2.f32 %v346_v15  ;;  %v344_v21 = vmin.f32 %v1649_v19, 20.0  ;;  %v1655_v23 = vpop.f32.mrb[3].mxu0 }
  0xf3   : > { %v467_v22 = vmin.f32 %v1651_v20, 20.0  ;;  %v1657_v24 = vpop.f32.mrb[3].mxu1  ;;  %1475 = vpow2.f32 %v469_v16  ;;  %v345_v25 = vmin.f32 %v1655_v23, 20.0 }
  0xf4   : > { %v468_v26 = vmin.f32 %v1657_v24, 20.0  ;;  %1477 = vpow2.f32 %v348_v17  ;;  %v350_v27 = vmul.f32 1.442695, %v344_v21 }
  0xf5   : > { %v473_v28 = vmul.f32 1.442695, %v467_v22  ;;  %1479 = vpow2.f32 %v471_v18  ;;  %v352_v29 = vmul.f32 1.442695, %v345_v25 }
  0xf6   : > { %v475_v30 = vmul.f32 1.442695, %v468_v26  ;;  %1481 = vpow2.f32 %v350_v27 }
  0xf7   : > { %1483 = vpow2.f32 %v473_v28 }
  0xf8   : > { %1485 = vpow2.f32 %v352_v29 }
  0xf9   : > { %1487 = vpow2.f32 %v475_v30 }
  0xfc   : > { %v1474_v31 = vpop.eup %1473 }
  0xfd   : > { %v1476_v32 = vpop.eup %1475  ;;  %v354_v33 = vadd.f32 1.0, %v1474_v31 }
  0xfe   : > { %v1478_v34 = vpop.eup %1477  ;;  %v477_v35 = vadd.f32 1.0, %v1476_v32 }
  0xff   : > { %v1480_v36 = vpop.eup %1479  ;;  %v358_v37 = vmul.f32 %v354_v33, %v354_v33  ;;  %v355_v38 = vadd.f32 1.0, %v1478_v34 }
 0x100   : > { %v1482_v39 = vpop.eup %1481  ;;  %v481_v40 = vmul.f32 %v477_v35, %v477_v35  ;;  %v478_v41 = vadd.f32 1.0, %v1480_v36 }
 0x101   : > { %v1484_v42 = vpop.eup %1483  ;;  %v362_v43 = vadd.f32 1.0, %v358_v37  ;;  %v356_v44 = vadd.f32 1.0, %v1482_v39  ;;  %v359_v50 = vmul.f32 %v355_v38, %v355_v38 }
 0x102   : > { %v1486_v45 = vpop.eup %1485  ;;  %v485_v46 = vadd.f32 1.0, %v481_v40  ;;  %v482_v47 = vmul.f32 %v478_v41, %v478_v41  ;;  %v479_v48 = vadd.f32 1.0, %v1484_v42 }
 0x103   : > { %v1488_v49 = vpop.eup %1487  ;;  %1489 = vrcp.f32 %v362_v43  ;;  %v360_v51 = vmul.f32 %v356_v44, %v356_v44  ;;  %v357_v52 = vadd.f32 1.0, %v1486_v45  ;;  %v363_v61 = vadd.f32 1.0, %v359_v50 }
 0x104   : > { %1491 = vrcp.f32 %v485_v46  ;;  %v486_v53 = vadd.f32 1.0, %v482_v47  ;;  %v483_v54 = vmul.f32 %v479_v48, %v479_v48  ;;  %v480_v55 = vadd.f32 1.0, %v1488_v49 }
 0x105   : > { %v364_v56 = vadd.f32 1.0, %v360_v51  ;;  %v361_v57 = vmul.f32 %v357_v52, %v357_v52 }
 0x106   : > { %1493 = vrcp.f32 %v486_v53  ;;  %v487_v58 = vadd.f32 1.0, %v483_v54  ;;  %v484_v59 = vmul.f32 %v480_v55, %v480_v55 }
 0x107   : > { %1495 = vrcp.f32 %v364_v56  ;;  %v365_v60 = vadd.f32 1.0, %v361_v57  ;;  %v1707_v56 = vstv %s255_s15 }
 0x108   : > { %1497 = vrcp.f32 %v487_v58  ;;  %v488_v62 = vadd.f32 1.0, %v484_v59 }
 0x109   : > { %1499 = vrcp.f32 %v365_v60 }
 0x10a   : > { %1501 = vrcp.f32 %v488_v62 }
 0x10b   : > { %1503 = vrcp.f32 %v363_v61 }
 0x10d   : > { %v1490_v63 = vpop.eup %1489 }
 0x10e   : > { %v1492_v0 = vpop.eup %1491  ;;  %v370_v1 = vmul.f32 2.0, %v1490_v63 }
 0x10f   : > { %v493_v2 = vmul.f32 2.0, %v1492_v0 }
 0x110   : > { %v1494_v3 = vpop.eup %1493  ;;  %v374_v4 = vsub.f32 1.0, %v370_v1 }
 0x111   : > { %v1496_v5 = vpop.eup %1495  ;;  %v494_v6 = vmul.f32 2.0, %v1494_v3  ;;  %v497_v15 = vsub.f32 1.0, %v493_v2 }
 0x112   : > { %v1498_v9 = vpop.eup %1497  ;;  %v1662_v10 = vmul.f32 %v374_v4, %v1637_v7  ;;  %v372_v13 = vmul.f32 2.0, %v1496_v5 }
 0x113   : > { %v1500_v14 = vpop.eup %1499  ;;  %v495_v16 = vmul.f32 2.0, %v1498_v9  ;;  %v498_v21 = vsub.f32 1.0, %v494_v6  ;;  %v1669_v28 = vmul.f32 %v497_v15, %v1639_v8 }
 0x114   : > { %v1502_v17 = vpop.eup %1501  ;;  %v376_v18 = vsub.f32 1.0, %v372_v13  ;;  %1386 = vmatprep.mubr.f32.mxu0 %v1662_v10  ;;  %v373_v29 = vmul.f32 2.0, %v1500_v14 }
 0x115   : > { %v499_v22 = vsub.f32 1.0, %v495_v16  ;;  %v496_v25 = vmul.f32 2.0, %v1502_v17  ;;  %v1504_v26 = vpop.eup %1503  ;;  %v1677_v33 = vmul.f32 %v498_v21, %v1645_v12 }
 0x116   : > { %v1666_v27 = vmul.f32 %v376_v18, %v1649_v19  ;;  %v371_v32 = vmul.f32 2.0, %v1504_v26  ;;  %v377_v8 = vsub.f32 1.0, %v373_v29 }
 0x117   : > { %v1672_v7 = vmul.f32 %v499_v22, %v1651_v20  ;;  %v500_v30 = vsub.f32 1.0, %v496_v25 }
 0x118   : > { %v1428_v31 = vpack.c.bf16 %v1666_v27, %v1662_v10  ;;  %v375_v35 = vsub.f32 1.0, %v371_v32  ;;  %v1690_v12 = vmul.f32 %v377_v8, %v1655_v23 }
 0x119   : > { %v1424_v34 = vpack.c.bf16 %v1672_v7, %v1669_v28  ;;  %v1682_v19 = vmul.f32 %v500_v30, %v1657_v24 }
 0x11a   : > { %1429 = vmatprep.subr.bf16.mxu1 %v1428_v31  ;;  %v1693_v36 = vmul.f32 %v375_v35, %v1643_v11 }
 0x11b   : > { %v1686_v20 = vpack.c.bf16 %v1682_v19, %v1677_v33  ;;  %1425 = vmatprep.subr.bf16.mxu0 %v1424_v34  ;;  %1431 = vmatpush3.bf16.msra.mxu1 %v1428_v31 }
 0x11c   : > { %1427 = vmatpush3.bf16.xpose.msra.mxu0 %v1424_v34  ;;  %v1698_v24 = vpack.c.bf16 %v1690_v12, %v1693_v36 }
 0x11d   : > { %1433 = vmatprep.subr.bf16.mxu0 %v1424_v34  ;;  %1437 = vmatprep.subr.bf16.mxu1 %v1686_v20 }
 0x123   : > { %1387 = vmatmul.mubr.f32.vlgmr.msra.gmra.mrb[4].mxu0 %v1666_v27 }
 0x124   : > { %1435 = vmatpush3.bf16.msra.mxu0 %v1424_v34 }
 0x125   : > { %1441 = vmatprep.subr.bf16.mxu0 %v1698_v24 }
 0x1f6   : > { %v1388_v37 = vpop.f32.mrb[4].mxu0 }
 0x1f7   : > { %v579_v38 = vpop.f32.mrb[5].mxu0  ;;  %v592_v23 = vsel %vm588_vm1, %v1388_v37, -inf }
 0x1f8   : > { %v589_v39 = vsel %vm588_vm1, %v579_v38, -inf }
 0x1f9   : > { %590 = vmax.xlane.f32.xlu0 %v589_v39 }
 0x1fd   : > { %593 = vmax.xlane.f32.xlu0 %v592_v23 }
 0x22a   : > { %614 = vxpose.xlu0.b32.start [1/2] (short) (narrow) %v579_v38, 16 }
 0x22e   : > { %615 = vxpose.xlu0.b32.end [2/2] (short) (narrow) %v1388_v37, 16 }
 0x286   : > { %v591_v11 = vpop.xlane.xlu0 %590 }
 0x287   : > { %v595_v40 = vsub.f32 %v579_v38, %v591_v11 }
 0x289   : > { %v597_v41 = vmul.f32 1.442695, %v595_v40 }
 0x28a   : > { %v594_v42 = vpop.xlane.xlu0 %593 }
 0x28b   : > { %1505 = vpow2.f32 %v597_v41  ;;  %v596_v43 = vsub.f32 %v1388_v37, %v594_v42 }
 0x28d   : > { %v599_v44 = vmul.f32 1.442695, %v596_v43 }
 0x28f   : > { %1507 = vpow2.f32 %v599_v44 }
 0x295   : > { %v1506_v45 = vpop.eup %1505 }
 0x296   : > { %v601_v46 = vsel %vm588_vm1, %v1506_v45, 0.0 }
 0x297   : > { %602 = vadd.xlane.f32.xlu1 %v601_v46 }
 0x299   : > { %v1508_v47 = vpop.eup %1507 }
 0x29a   : > { %v604_v48 = vsel %vm588_vm1, %v1508_v47, 0.0 }
 0x29b   : > { %605 = vadd.xlane.f32.xlu1 %v604_v48 }
 0x2aa   : > { %v630_v49 = vpop.trf.xlu0 }
 0x2ab   : > { %v646_v50 = vsel %vm588_vm1, %v630_v49, -inf }
 0x2ac   : > { %647 = vmax.xlane.f32.xlu0 %v646_v50 }
 0x2ae   : > { %v631_v51 = vpop.trf.xlu0 }
 0x2af   : > { %v649_v52 = vsel %vm588_vm1, %v631_v51, -inf }
 0x2b0   : > { %650 = vmax.xlane.f32.xlu1 %v649_v52 }
 0x324   : > { %v603_v53 = vpop.xlane.xlu1 %602 }
 0x325   : > { %1509 = vrcp.f32 %v603_v53 }
 0x328   : > { %v606_v54 = vpop.xlane.xlu1 %605 }
 0x329   : > { %1511 = vrcp.f32 %v606_v54 }
 0x32f   : > { %v1510_v55 = vpop.eup %1509 }
 0x330   : > { %v608_v57 = vmul.f32 %v1510_v55, %v1506_v45 }
 0x332   : > { %v612_v58 = vmul.f32 %v1707_v56, %v608_v57 }
 0x333   : > { %v1512_v59 = vpop.eup %1511 }
 0x334   : > { %v610_v60 = vmul.f32 %v1512_v59, %v1508_v47  ;;  %1393 = vmatprep.mubr.msk.f32.mxu1 %vm588_vm1, %v612_v58 }
 0x336   : > { %v613_v61 = vmul.f32 %v1707_v56, %v610_v60 }
 0x338   : > { %1394 = vmatmul.mubr.msk.f32.vlgmr.msra.gmra.mrb[4].mxu1 %vm588_vm1, %v613_v61 }
 0x339   : > { %1439 = vmatpush3.bf16.xpose.msra.mxu1 %v1686_v20  ;;  %1407 = vmatprep.mubr.f32.mxu1 %v1693_v36  ;;  %v648_v6 = vpop.xlane.xlu0 %647 }
 0x33a   : > { %v652_v9 = vsub.f32 %v630_v49, %v648_v6 }
 0x33c   : > { %v654_v15 = vmul.f32 1.442695, %v652_v9 }
 0x33d   : > { %v651_v13 = vpop.xlane.xlu1 %650 }
 0x33e   : > { %v653_v14 = vsub.f32 %v631_v51, %v651_v13  ;;  %1513 = vpow2.f32 %v654_v15 }
 0x340   : > { %1408 = vmatmul.mubr.f32.vlgmr.msra.gmra.mrb[6].mxu1 %v1690_v12  ;;  %v656_v18 = vmul.f32 1.442695, %v653_v14 }
 0x342   : > { %1515 = vpow2.f32 %v656_v18 }
 0x348   : > { %v1514_v29 = vpop.eup %1513 }
 0x349   : > { %v658_v34 = vsel %vm588_vm1, %v1514_v29, 0.0 }
 0x34c   : > { %v1516_v31 = vpop.eup %1515 }
 0x34d   : > { %v661_v35 = vsel %vm588_vm1, %v1516_v31, 0.0 }
 0x40b   : > { %v1395_v62 = vpop.f32.mrb[4].mxu1 }
 0x40c   : > { %v748_v63 = vadd.f32 %v1395_v62, %v1666_v27  ;;  %v742_v0 = vpop.f32.mrb[5].mxu1 }
 0x40d   : > { %v743_v1 = vadd.f32 %v742_v0, %v1662_v10 }
 0x40e   : > { %833 = vst [vmem:[%s1722_s18 + $0x10] sm:$0xff] %v748_v63 }
 0x40f   : > { %832 = vst [vmem:[%s1722_s18] sm:$0xff] %v743_v1 }
 0x413   : > { %v1409_v2 = vpop.f32.mrb[6].mxu1 }
 0x414   : > { %v908_v3 = vpop.f32.mrb[7].mxu1  ;;  %v920_v4 = vsel %vm588_vm1, %v1409_v2, -inf }
 0x415   : > { %921 = vmax.xlane.f32.xlu1 %v920_v4  ;;  %v917_v5 = vsel %vm588_vm1, %v908_v3, -inf }
 0x416   : > { %918 = vmax.xlane.f32.xlu0 %v917_v5 }
 0x448   : > { %941 = vxpose.xlu1.b32.start [1/2] (short) (narrow) %v908_v3, 16 }
 0x44c   : > { %942 = vxpose.xlu1.b32.end [2/2] (short) (narrow) %v1409_v2, 16 }
 0x4a2   : > { %v922_v17 = vpop.xlane.xlu1 %921 }
 0x4a3   : > { %v919_v10 = vpop.xlane.xlu0 %918  ;;  %v924_v21 = vsub.f32 %v1409_v2, %v922_v17 }
 0x4a4   : > { %v923_v16 = vsub.f32 %v908_v3, %v919_v10 }
 0x4a5   : > { %v927_v25 = vmul.f32 1.442695, %v924_v21 }
 0x4a6   : > { %v925_v22 = vmul.f32 1.442695, %v923_v16 }
 0x4a8   : > { %1517 = vpow2.f32 %v925_v22  ;;  %v1195_v22 = vld [vmem:[%s1722_s18 + $0x10] sm:$0xff] (%p1620_p4) }
 0x4a9   : > { %1519 = vpow2.f32 %v927_v25  ;;  %1196 = vst [vmem:[%s1178_s25 + $0x80] sm:$0xff] (%p1620_p4), %v1195_v22 }
 0x4b2   : > { %v1518_v8 = vpop.eup %1517 }
 0x4b3   : > { %v929_v37 = vsel %vm588_vm1, %v1518_v8, 0.0  ;;  %v1520_v38 = vpop.eup %1519 }
 0x4b4   : > { %v932_v39 = vsel %vm588_vm1, %v1520_v38, 0.0 }
 0x4c8   : > { %v957_v26 = vpop.trf.xlu1 }
 0x4c9   : > { %v973_v27 = vsel %vm588_vm1, %v957_v26, -inf }
 0x4ca   : > { %974 = vmax.xlane.f32.xlu0 %v973_v27 }
 0x4cc   : > { %v958_v30 = vpop.trf.xlu1 }
 0x4cd   : > { %v976_v32 = vsel %vm588_vm1, %v958_v30, -inf }
 0x4ce   : > { %977 = vmax.xlane.f32.xlu1 %v976_v32  ;;  %659 = vadd.xlane.f32.xlu0 %v658_v34 }
 0x4d2   : > { %662 = vadd.xlane.f32.xlu1 %v661_v35  ;;  %930 = vadd.xlane.f32.xlu0 %v929_v37 }
 0x4d6   : > { %933 = vadd.xlane.f32.xlu1 %v932_v39 }
 0x557   : > { %v975_v23 = vpop.xlane.xlu0 %974 }
 0x558   : > { %v979_v11 = vsub.f32 %v957_v26, %v975_v23 }
 0x55a   : > { %v981_v40 = vmul.f32 1.442695, %v979_v11 }
 0x55b   : > { %v978_v41 = vpop.xlane.xlu1 %977  ;;  %v660_v42 = vpop.xlane.xlu0 %659 }
 0x55c   : > { %1521 = vpow2.f32 %v981_v40  ;;  %v980_v43 = vsub.f32 %v958_v30, %v978_v41 }
 0x55d   : > { %1523 = vrcp.f32 %v660_v42 }
 0x55e   : > { %v983_v44 = vmul.f32 1.442695, %v980_v43 }
 0x55f   : > { %v663_v45 = vpop.xlane.xlu1 %662  ;;  %v931_v46 = vpop.xlane.xlu0 %930 }
 0x560   : > { %1525 = vpow2.f32 %v983_v44 }
 0x561   : > { %1527 = vrcp.f32 %v663_v45 }
 0x562   : > { %1529 = vrcp.f32 %v931_v46 }
 0x563   : > { %v934_v47 = vpop.xlane.xlu1 %933 }
 0x564   : > { %1531 = vrcp.f32 %v934_v47 }
 0x566   : > { %v1522_v48 = vpop.eup %1521 }
 0x567   : > { %v1524_v49 = vpop.eup %1523  ;;  %v985_v50 = vsel %vm588_vm1, %v1522_v48, 0.0 }
 0x568   : > { %986 = vadd.xlane.f32.xlu0 %v985_v50  ;;  %v665_v51 = vmul.f32 %v1524_v49, %v1514_v29 }
 0x56a   : > { %v1526_v52 = vpop.eup %1525  ;;  %v668_v53 = vmul.f32 %v665_v51, %v1707_v56 }
 0x56b   : > { %v1528_v54 = vpop.eup %1527  ;;  %v988_v55 = vsel %vm588_vm1, %v1526_v52, 0.0 }
 0x56c   : > { %v1530_v57 = vpop.eup %1529  ;;  %v667_v58 = vmul.f32 %v1528_v54, %v1516_v31  ;;  %1400 = vmatprep.mubr.msk.f32.mxu0 %vm588_vm1, %v668_v53  ;;  %989 = vadd.xlane.f32.xlu1 %v988_v55 }
 0x56d   : > { %v936_v59 = vmul.f32 %v1530_v57, %v1518_v8 }
 0x56e   : > { %v1532_v60 = vpop.eup %1531  ;;  %v669_v61 = vmul.f32 %v667_v58, %v1707_v56 }
 0x56f   : > { %v938_v62 = vmul.f32 %v1532_v60, %v1520_v38  ;;  %v939_v63 = vmul.f32 %v936_v59, %v1707_v56 }
 0x570   : > { %1401 = vmatmul.mubr.msk.f32.vlgmr.msra.gmra.mrb[6].mxu0 %vm588_vm1, %v669_v61 }
 0x571   : > { %1443 = vmatpush3.bf16.msra.mxu0 %v1698_v24  ;;  %1414 = vmatprep.mubr.msk.f32.mxu0 %vm588_vm1, %v939_v63  ;;  %v940_v0 = vmul.f32 %v938_v62, %v1707_v56 }
 0x572   : > { %1445 = vmatprep.subr.bf16.mxu0 %v1686_v20 }
 0x574   : > { %1415 = vmatmul.mubr.msk.f32.vlgmr.msra.gmra.mrb[8].mxu0 %vm588_vm1, %v940_v0 }
 0x575   : > { %1447 = vmatpush3.bf16.msra.mxu0 %v1686_v20 }
 0x5f5   : > { %v987_v1 = vpop.xlane.xlu0 %986 }
 0x5f6   : > { %1533 = vrcp.f32 %v987_v1 }
 0x5f9   : > { %v990_v2 = vpop.xlane.xlu1 %989 }
 0x5fa   : > { %1535 = vrcp.f32 %v990_v2 }
 0x600   : > { %v1534_v3 = vpop.eup %1533 }
 0x601   : > { %v992_v4 = vmul.f32 %v1534_v3, %v1522_v48 }
 0x603   : > { %v995_v5 = vmul.f32 %v992_v4, %v1707_v56 }
 0x604   : > { %v1536_v24 = vpop.eup %1535 }
 0x605   : > { %v994_v6 = vmul.f32 %v1536_v24, %v1526_v52  ;;  %1421 = vmatprep.mubr.msk.f32.mxu0 %vm588_vm1, %v995_v5 }
 0x607   : > { %v996_v9 = vmul.f32 %v994_v6, %v1707_v56 }
 0x609   : > { %1422 = vmatmul.mubr.msk.f32.vlgmr.msra.gmra.mrb[10].mxu0 %vm588_vm1, %v996_v9 }
 0x643   : > { %v1402_v20 = vpop.f32.mrb[6].mxu0 }
 0x644   : > { %v829_v13 = vadd.f32 %v1402_v20, %v1672_v7  ;;  %v823_v10 = vpop.f32.mrb[7].mxu0 }
 0x645   : > { %v824_v14 = vadd.f32 %v823_v10, %v1669_v28 }
 0x646   : > { %835 = vst [vmem:[%s1754_s19 + $0x10] sm:$0xff] %v829_v13 }
 0x647   : > { %834 = vst [vmem:[%s1754_s19] sm:$0xff] %v824_v14  ;;  %v1416_v15 = vpop.f32.mrb[8].mxu0 }
 0x648   : > { %v1075_v16 = vadd.f32 %v1416_v15, %v1690_v12  ;;  %v1069_v56 = vpop.f32.mrb[9].mxu0  ;;  %v1191_v12 = vld [vmem:[%s1722_s18] sm:$0xff] (%p1620_p4) }
 0x649   : > { %v1070_v17 = vadd.f32 %v1069_v56, %v1693_v36  ;;  %1192 = vst [vmem:[%s1178_s25] sm:$0xff] (%p1620_p4), %v1191_v12 }
 0x64a   : > { %1345 = vst [vmem:[%s1722_s18 + $0x18] sm:$0xff] %v1075_v16 }
 0x64b   : > { %1344 = vst [vmem:[%s1722_s18 + $0x8] sm:$0xff] %v1070_v17 }
 0x652   : > { %v1193_v36 = vld [vmem:[%s1722_s18 + $0x8] sm:$0xff] (%p1620_p4) }
 0x653   : > { %1194 = vst [vmem:[%s1178_s25 + $0x8] sm:$0xff] (%p1620_p4), %v1193_v36 }
 0x6da   : > { %1175 = sbr.rel (!%p1620_p4) target bundleno = 1761 (0x6e1), region = 40 }
 0x6dc   : > { %v1423_v7 = vpop.f32.mrb[10].mxu0 }
 0x6dd   : > { %v1156_v18 = vadd.f32 %v1423_v7, %v1682_v19  ;;  %v1150_v28 = vpop.f32.mrb[11].mxu0  ;;  %v1197_v19 = vld [vmem:[%s1722_s18 + $0x18] sm:$0xff] (%p1620_p4) }
 0x6de   : > { %v1151_v21 = vadd.f32 %v1150_v28, %v1677_v33  ;;  %1198 = vst [vmem:[%s1178_s25 + $0x88] sm:$0xff] (%p1620_p4), %v1197_v19 }
 0x6df   : > { %1347 = vst [vmem:[%s1754_s19 + $0x18] sm:$0xff] %v1156_v18 }
 0x6e0   : > { %1346 = vst [vmem:[%s1754_s19 + $0x8] sm:$0xff] %v1151_v21 }
 0x6e1 PF: > { %1204 = sbr.rel (!%p1620_p4) target bundleno = 1769 (0x6e9), region = 63  ;;  %s1357_s28 = sshll.u32 (%p1620_p4), %s1608_s1, 4  ;;  %v1220_v33 = vld [vmem:[%s1754_s19] sm:$0xff] (%p1620_p4)  ;;  %v1224_v26 = vld [vmem:[%s1754_s19 + $0x10] sm:$0xff] (%p1620_p4) }
 0x6e2   : > { %s1207_s6 = scalar_lea.vmem (%p1620_p4), %s1801_s5, %s1357_s28 }
 0x6e3   : > { %1221 = vst [vmem:[%s1207_s6] sm:$0xff] (%p1620_p4), %v1220_v33  ;;  %1225 = vst [vmem:[%s1207_s6 + $0x80] sm:$0xff] (%p1620_p4), %v1224_v26 }
 0x6e6   : > { %v1226_v27 = vld [vmem:[%s1754_s19 + $0x18] sm:$0xff] (%p1620_p4) }
 0x6e7   : > { %v1222_v25 = vld [vmem:[%s1754_s19 + $0x8] sm:$0xff] (%p1620_p4)  ;;  %1227 = vst [vmem:[%s1207_s6 + $0x88] sm:$0xff] (%p1620_p4), %v1226_v27 }
 0x6e8   : > { %1223 = vst [vmem:[%s1207_s6 + $0x8] sm:$0xff] %v1222_v25 }
 0x6e9 PF: > { %p14_p8 = scmp.ge.s32.totalorder %s1610_s23, 10   ;;  %s1803_s20 = smov %s1555_s21 }
 0x6ea   : > { %s1804_s21 = smov %s1618_s26  ;;  %s1805_s22 = smov %s1610_s23 }
 0x6eb   :  { %16 = sbr.rel (!%p14_p8) target bundleno = 4 (0x4), region = 131 }

</bundles_post_ra>
